<compile_context>
chip_gen: v5e
topology: v5e:2x2
jax: 0.10.0
libtpu: 0.0.40
codegen_flags: <defaults>
</compile_context>

<pallas_src>
import functools

import numpy as np
import jax
import jax.numpy as jnp
from jax.experimental import pallas as pl
from jax.experimental.pallas import tpu as pltpu


# ----------------------------------------------------------------------------
# Kernel
# ----------------------------------------------------------------------------
def _fused_group_attention_kernel(x_ref, w_ref, b_ref, o_ref,
                                  acc_ref, qkv_ref, *, L, D, scale):
    """Grid = (group, k_tile).  Per-step shapes:
         x_ref   : (1, B, tk)        activation tile (flattened group slice)
         w_ref   : (1, tk, 3*L*D)    fused token-interleaved [Q|K|V] weights
         b_ref   : (1, 1, 3*L*D)     fused bias (same interleaved layout)
         o_ref   : (1, B, L, D)      attention output for this group
         acc_ref : (B, 3*L*D) f32    QKV accumulator (VMEM scratch)
         qkv_ref : (B, L, 3*D) f32   relayout buffer  (VMEM scratch)
    """
    k_step = pl.program_id(1)

    @pl.when(k_step == 0)
    def _init():
        acc_ref[...] = jnp.zeros_like(acc_ref)

    # One wide MXU matmul per reduction tile: (B, tk) @ (tk, 3*L*D).
    acc_ref[...] += jnp.dot(x_ref[0], w_ref[0],
                            preferred_element_type=jnp.float32)

    @pl.when(k_step == pl.num_programs(1) - 1)
    def _finalize():
        td = 3 * D
        # (B, 3*L*D) -> (B, L, 3*D). Weight columns are pre-interleaved per
        # token, so each token costs exactly ONE contiguous lane-slice copy
        # (L copies total vs. 3*L before); the bias add is folded in, which
        # saves a full extra pass over the QKV slab.
        # TODO(synk): for very large L replace with a layout-preserving
        #             minor-dim reshape / strided DMA instead of L copies.
        for l in range(L):
            lo = l * td
            qkv_ref[:, l, :] = acc_ref[:, lo:lo + td] + b_ref[0, :, lo:lo + td]

        Q = qkv_ref[:, :, 0:D]
        K = qkv_ref[:, :, D:2 * D]
        V = qkv_ref[:, :, 2 * D:3 * D]

        scores = jnp.einsum('bqd,bkd->bqk', Q, K,
                            preferred_element_type=jnp.float32)

        # nn.Softmax(dim=1): normalize over the QUERY axis (axis=1); the
        # 1/sqrt(D) scale is applied AFTER the softmax — intentional, this is
        # exactly what the PyTorch module does.
        m = jnp.max(scores, axis=1, keepdims=True)
        e = jnp.exp(scores - m)
        denom = jnp.sum(e, axis=1, keepdims=True)
        inv = pl.reciprocal(denom, approx=True)      # EUP slot (≈ free)
        inv = inv * (2.0 - denom * inv)              # one Newton step, tiny tensor
        p = e * (inv * scale)                        # fold post-softmax 1/sqrt(D)
        z = jnp.einsum('bqk,bkd->bqd', p, V,
                       preferred_element_type=jnp.float32)
        o_ref[0] = z.astype(o_ref.dtype)


# ----------------------------------------------------------------------------
# Helpers
# ----------------------------------------------------------------------------
def _round_up(x, m):
    return (x + m - 1) // m * m


def _f32_tile_bytes(shape):
    shape = tuple(int(s) for s in shape)
    if len(shape) == 1:
        padded = (max(_round_up(shape[0], 128), 128),)
    else:
        padded = shape[:-2] + (_round_up(shape[-2], 8), _round_up(shape[-1], 128))
    n = 1
    for s in padded:
        n *= s
    return 4 * n


def _pick_tk(reduction_dim, n_cols, budget=8 * 1024 * 1024):
    """Largest 128-multiple divisor of the reduction dim whose weight tile
    stays under ~8 MiB; fall back to the smallest 128-multiple divisor, then
    to the full reduction dim."""
    best_fit, smallest = None, None
    k = 128
    while k <= reduction_dim:
        if reduction_dim % k == 0:
            if smallest is None:
                smallest = k
            if k * n_cols * 4 <= budget:
                best_fit = k
        k += 128
    if best_fit is not None:
        return best_fit
    if smallest is not None:
        return smallest
    return reduction_dim


# ----------------------------------------------------------------------------
# Parameters (separate Wq/Wk/Wv for the reference + fused interleaved layout
# for the kernel, fused ONCE at init so no per-forward weight reshuffling)
# ----------------------------------------------------------------------------
def _head_params(key, L, E, D):
    C = L * E
    lim = 1.0 / np.sqrt(C)
    ks = jax.random.split(key, 6)

    def u(k, shape):
        return jax.random.uniform(k, shape, jnp.float32, -lim, lim)

    wq, bq = u(ks[0], (C, L * D)), u(ks[1], (L * D,))
    wk, bk = u(ks[2], (C, L * D)), u(ks[3], (L * D,))
    wv, bv = u(ks[4], (C, L * D)), u(ks[5], (L * D,))

    # Token-interleaved fused layout: column index = l*(3*D) + t*D + d.
    w_fused = jnp.stack([wq.reshape(C, L, D),
                         wk.reshape(C, L, D),
                         wv.reshape(C, L, D)], axis=2).reshape(C, 3 * L * D)
    b_fused = jnp.stack([bq.reshape(L, D),
                         bk.reshape(L, D),
                         bv.reshape(L, D)], axis=1).reshape(1, 3 * L * D)
    return dict(wq=wq, bq=bq, wk=wk, bk=bk, wv=wv, bv=bv,
                w_fused=w_fused, b_fused=b_fused)


def init_params(key, input_size, seq_length, embedding_size, qkv_size, indices):
    block = seq_length // input_size
    indices = np.asarray(indices)
    _, counts = np.unique(indices, return_counts=True)
    params = []
    for c in counts:
        L = block * int(c)                       # per-group sequence length
        key, sub = jax.random.split(key)
        params.append(_head_params(sub, L, embedding_size, qkv_size))
    return params


# ----------------------------------------------------------------------------
# Forward
# ----------------------------------------------------------------------------
def structural_self_attention(sequence, params, indices, input_size, seq_length,
                              embedding_size, qkv_size):
    """Pallas-backed forward; matches StructuralSelfAttention(..., masked=False)."""
    B = sequence.shape[0]
    E = embedding_size
    D = qkv_size
    block = seq_length // input_size
    idx_tok = np.repeat(np.asarray(indices), block)      # torch repeat_interleave
    num_heads = len(params)

    pos_per_group = [np.nonzero(idx_tok == g)[0] for g in range(num_heads)]
    Ls = [int(p.shape[0]) for p in pos_per_group]

    # Groups with equal L share one pallas_call (the grid over groups
    # prefetches group g+1 weights while computing group g).
    classes = {}
    for g, Lg in enumerate(Ls):
        classes.setdefault(Lg, []).append(g)

    z_per_group = [None] * num_heads
    for L, group_ids in sorted(classes.items()):
        n = len(group_ids)
        C = L * E                         # flattened input / reduction dim
        ncols = 3 * L * D                 # fused QKV output dim

        xs = jnp.stack([sequence[:, pos_per_group[g], :].astype(jnp.float32)
                        .reshape(B, C) for g in group_ids])           # (n, B, C)
        ws = jnp.stack([params[g]['w_fused'] for g in group_ids])     # (n, C, ncols)
        bs = jnp.stack([params[g]['b_fused'] for g in group_ids])     # (n, 1, ncols)

        tk = _pick_tk(C, ncols)
        n_k = C // tk

        # Weight streaming is the roofline when B is small -> deepen buffering
        # on the weight BlockSpec when there are enough grid steps to use it.
        if n * n_k >= 3:
            w_spec = pl.BlockSpec((1, tk, ncols), lambda g, k: (g, k, 0),
                                  pipeline_mode=pl.Buffered(3))
            w_bufs = 3
        else:
            w_spec = pl.BlockSpec((1, tk, ncols), lambda g, k: (g, k, 0))
            w_bufs = 2

        # VMEM budget estimate -> raise the scoped limit only when the default
        # would be too small (leave headroom, cap below physical).
        need = (2 * (_f32_tile_bytes((1, B, tk))
                     + _f32_tile_bytes((1, 1, ncols))
                     + _f32_tile_bytes((1, B, L, D)))
                + w_bufs * _f32_tile_bytes((1, tk, ncols))
                + _f32_tile_bytes((B, ncols))
                + _f32_tile_bytes((B, L, 3 * D)))
        cp_kwargs = {"dimension_semantics": ("parallel", "arbitrary")}
        if need > 24 * 2**20:
            cp_kwargs["vmem_limit_bytes"] = int(min(max(2 * need, 32 * 2**20),
                                                    100 * 2**20))

        out_stack = pl.pallas_call(
            functools.partial(_fused_group_attention_kernel,
                              L=L, D=D, scale=1.0 / float(D) ** 0.5),
            out_shape=jax.ShapeDtypeStruct((n, B, L, D), jnp.float32),
            grid_spec=pltpu.PrefetchScalarGridSpec(
                num_scalar_prefetch=0,
                grid=(n, n_k),
                in_specs=[
                    pl.BlockSpec((1, B, tk), lambda g, k: (g, 0, k)),
                    w_spec,
                    pl.BlockSpec((1, 1, ncols), lambda g, k: (g, 0, 0)),
                ],
                out_specs=pl.BlockSpec((1, B, L, D), lambda g, k: (g, 0, 0, 0)),
                scratch_shapes=[
                    pltpu.VMEM((B, ncols), jnp.float32),
                    pltpu.VMEM((B, L, 3 * D), jnp.float32),
                ]),
            compiler_params=pltpu.CompilerParams(**cp_kwargs),
        )(xs, ws, bs)

        for i, g in enumerate(group_ids):
            z_per_group[g] = out_stack[i]

    # Single static permutation instead of per-group .at[].set() scatters.
    all_pos = np.concatenate([pos_per_group[g] for g in range(num_heads)])
    z_concat = jnp.concatenate([z_per_group[g] for g in range(num_heads)], axis=1)
    inverse = np.empty(seq_length, dtype=np.int32)
    inverse[all_pos] = np.arange(seq_length, dtype=np.int32)
    if np.array_equal(inverse, np.arange(seq_length)):
        return z_concat
    return z_concat[:, inverse, :]


# ----------------------------------------------------------------------------
# Pure-JAX reference (mirrors the PyTorch forward exactly, separate Wq/Wk/Wv)
# ----------------------------------------------------------------------------
def reference(sequence, params, indices, input_size, seq_length,
              embedding_size, qkv_size):
    B = sequence.shape[0]
    D = qkv_size
    block = seq_length // input_size
    idx_tok = np.repeat(np.asarray(indices), block)
    out = jnp.zeros((B, seq_length, D), jnp.float32)
    for g, p in enumerate(params):
        pos = np.nonzero(idx_tok == g)[0]
        L = int(pos.shape[0])
        x = sequence[:, pos, :].astype(jnp.float32).reshape(B, L * embedding_size)
        Q = (x @ p['wq'] + p['bq']).reshape(B, L, D)
        K = (x @ p['wk'] + p['bk']).reshape(B, L, D)
        V = (x @ p['wv'] + p['bv']).reshape(B, L, D)
        scores = jnp.einsum('bqd,bkd->bqk', Q, K)
        attn = jax.nn.softmax(scores, axis=1)            # dim=1, as in torch
        Z = jnp.einsum('bqk,bkd->bqd', attn, V) * (1.0 / float(D) ** 0.5)
        out = out.at[:, pos, :].set(Z)
    return out


# ----------------------------------------------------------------------------
if __name__ == "__main__":
    input_size = 4
    seq_length = 16          # block per input slot = 16 // 4 = 4 tokens
    embedding_size = 8
    qkv_size = 8
    indices = np.array([0, 1, 0, 1], dtype=np.int32)     # 2 groups, 2 blocks each
    B = 2

    key = jax.random.PRNGKey(0)
    k_seq, k_par = jax.random.split(key)
    sequence = jax.random.normal(k_seq, (B, seq_length, embedding_size), jnp.float32)
    params = init_params(k_par, input_size, seq_length, embedding_size, qkv_size, indices)

    out = structural_self_attention(sequence, params, indices, input_size,
                                    seq_length, embedding_size, qkv_size)
    out = jax.block_until_ready(out)

    ref = reference(sequence, params, indices, input_size,
                    seq_length, embedding_size, qkv_size)
    np.testing.assert_allclose(np.asarray(out), np.asarray(ref), rtol=2e-3, atol=2e-3)
    print("KERNEL_OK")
</pallas_src>

<mosaic_0001>
module attributes {stable_mosaic.version = 11 : i64} {
  func.func @_fused_group_attention_kernel(%arg0: i32, %arg1: i32, %arg2: memref<1x2x64xf32, #tpu.memory_space<vmem>>, %arg3: memref<1x64x192xf32, #tpu.memory_space<vmem>>, %arg4: memref<1x1x192xf32, #tpu.memory_space<vmem>>, %arg5: memref<1x2x8x8xf32, #tpu.memory_space<vmem>>, %arg6: memref<2x192xf32, #tpu.memory_space<vmem>>, %arg7: memref<2x8x24xf32, #tpu.memory_space<vmem>>) attributes {dimension_semantics = [#tpu.dimension_semantics<parallel>, #tpu.dimension_semantics<arbitrary>], iteration_bounds = array<i64: 2, 1>, scalar_prefetch = 0 : i64, scratch_operands = 2 : i64, tpu.core_type = #tpu.core_type<tc>, window_params = [{transform_indices = @transform_0, window_bounds = array<i64: 1, 2, 64>}, {transform_indices = @transform_1, window_bounds = array<i64: 1, 64, 192>}, {transform_indices = @transform_2, window_bounds = array<i64: 1, 1, 192>}, {transform_indices = @transform_3, window_bounds = array<i64: 1, 2, 8, 8>}]} {
    %c0_i32 = arith.constant 0 : i32
    %0 = arith.cmpi eq, %arg1, %c0_i32 : i32
    %1 = arith.extui %0 : i1 to i32
    %c0_i32_0 = arith.constant 0 : i32
    %2 = arith.cmpi ne, %1, %c0_i32_0 : i32
    scf.if %2 {
      %cst_12 = arith.constant 0.000000e+00 : f32
      %14 = vector.broadcast %cst_12 : f32 to vector<2x192xf32>
      %c0_13 = arith.constant 0 : index
      %c0_14 = arith.constant 0 : index
      %15 = vector.load %arg6[%c0_13, %c0_14] : memref<2x192xf32, #tpu.memory_space<vmem>>, vector<2x192xf32>
      tpu.vector_store %arg6[%c0_13, %c0_14], %14 {strides = array<i32>} : memref<2x192xf32, #tpu.memory_space<vmem>>, vector<2x192xf32>,
    } else {
    }
    %c0 = arith.constant 0 : index
    %c0_1 = arith.constant 0 : index
    %3 = vector.load %arg6[%c0, %c0_1] : memref<2x192xf32, #tpu.memory_space<vmem>>, vector<2x192xf32>
    %c0_2 = arith.constant 0 : index
    %c0_3 = arith.constant 0 : index
    %c0_4 = arith.constant 0 : index
    %4 = vector.load %arg2[%c0_2, %c0_3, %c0_4] : memref<1x2x64xf32, #tpu.memory_space<vmem>>, vector<1x2x64xf32>
    %5 = vector.shape_cast %4 : vector<1x2x64xf32> to vector<2x64xf32>
    %c0_5 = arith.constant 0 : index
    %c0_6 = arith.constant 0 : index
    %c0_7 = arith.constant 0 : index
    %6 = vector.load %arg3[%c0_5, %c0_6, %c0_7] : memref<1x64x192xf32, #tpu.memory_space<vmem>>, vector<1x64x192xf32>
    %7 = vector.shape_cast %6 : vector<1x64x192xf32> to vector<64x192xf32>
    %cst = arith.constant dense<0.000000e+00> : vector<2x192xf32>
    %8 = tpu.matmul %5, %7, %cst {dimension_numbers = #tpu.dot_dimension_numbers<[1], [0], [0], [1], [0, 0, 1, 1], [], []>} : vector<2x64xf32>, vector<64x192xf32>, vector<2x192xf32> -> vector<2x192xf32>
    %9 = arith.addf %3, %8 : vector<2x192xf32>
    %c0_8 = arith.constant 0 : index
    %c0_9 = arith.constant 0 : index
    %10 = vector.load %arg6[%c0_8, %c0_9] : memref<2x192xf32, #tpu.memory_space<vmem>>, vector<2x192xf32>
    tpu.vector_store %arg6[%c0_8, %c0_9], %9 {strides = array<i32>} : memref<2x192xf32, #tpu.memory_space<vmem>>, vector<2x192xf32>,
    %c0_i32_10 = arith.constant 0 : i32
    %11 = arith.cmpi eq, %arg1, %c0_i32_10 : i32
    %12 = arith.extui %11 : i1 to i32
    %c0_i32_11 = arith.constant 0 : i32
    %13 = arith.cmpi ne, %12, %c0_i32_11 : i32
    scf.if %13 {
      %c0_12 = arith.constant 0 : index
      %c0_13 = arith.constant 0 : index
      %14 = vector.load %arg6[%c0_12, %c0_13] : memref<2x192xf32, #tpu.memory_space<vmem>>, vector<2x24xf32>
      %c0_14 = arith.constant 0 : index
      %c0_15 = arith.constant 0 : index
      %c0_16 = arith.constant 0 : index
      %15 = vector.load %arg4[%c0_14, %c0_15, %c0_16] : memref<1x1x192xf32, #tpu.memory_space<vmem>>, vector<1x1x24xf32>
      %16 = vector.shape_cast %15 : vector<1x1x24xf32> to vector<1x24xf32>
      %17 = vector.broadcast %16 : vector<1x24xf32> to vector<2x24xf32>
      %18 = arith.addf %14, %17 : vector<2x24xf32>
      %c0_17 = arith.constant 0 : index
      %c0_18 = arith.constant 0 : index
      %c0_19 = arith.constant 0 : index
      %19 = vector.load %arg7[%c0_17, %c0_18, %c0_19] : memref<2x8x24xf32, #tpu.memory_space<vmem>>, vector<2x1x24xf32>
      %20 = vector.shape_cast %19 : vector<2x1x24xf32> to vector<2x24xf32>
      %21 = vector.shape_cast %18 : vector<2x24xf32> to vector<2x1x24xf32>
      tpu.vector_store %arg7[%c0_17, %c0_18, %c0_19], %21 {strides = array<i32>} : memref<2x8x24xf32, #tpu.memory_space<vmem>>, vector<2x1x24xf32>,
      %c0_20 = arith.constant 0 : index
      %c24 = arith.constant 24 : index
      %22 = vector.load %arg6[%c0_20, %c24] : memref<2x192xf32, #tpu.memory_space<vmem>>, vector<2x24xf32>
      %c0_21 = arith.constant 0 : index
      %c0_22 = arith.constant 0 : index
      %c24_23 = arith.constant 24 : index
      %23 = vector.load %arg4[%c0_21, %c0_22, %c24_23] : memref<1x1x192xf32, #tpu.memory_space<vmem>>, vector<1x1x24xf32>
      %24 = vector.shape_cast %23 : vector<1x1x24xf32> to vector<1x24xf32>
      %25 = vector.broadcast %24 : vector<1x24xf32> to vector<2x24xf32>
      %26 = arith.addf %22, %25 : vector<2x24xf32>
      %c0_24 = arith.constant 0 : index
      %c1 = arith.constant 1 : index
      %c0_25 = arith.constant 0 : index
      %27 = vector.load %arg7[%c0_24, %c1, %c0_25] : memref<2x8x24xf32, #tpu.memory_space<vmem>>, vector<2x1x24xf32>
      %28 = vector.shape_cast %27 : vector<2x1x24xf32> to vector<2x24xf32>
      %29 = vector.shape_cast %26 : vector<2x24xf32> to vector<2x1x24xf32>
      tpu.vector_store %arg7[%c0_24, %c1, %c0_25], %29 {strides = array<i32>} : memref<2x8x24xf32, #tpu.memory_space<vmem>>, vector<2x1x24xf32>,
      %c0_26 = arith.constant 0 : index
      %c48 = arith.constant 48 : index
      %30 = vector.load %arg6[%c0_26, %c48] : memref<2x192xf32, #tpu.memory_space<vmem>>, vector<2x24xf32>
      %c0_27 = arith.constant 0 : index
      %c0_28 = arith.constant 0 : index
      %c48_29 = arith.constant 48 : index
      %31 = vector.load %arg4[%c0_27, %c0_28, %c48_29] : memref<1x1x192xf32, #tpu.memory_space<vmem>>, vector<1x1x24xf32>
      %32 = vector.shape_cast %31 : vector<1x1x24xf32> to vector<1x24xf32>
      %33 = vector.broadcast %32 : vector<1x24xf32> to vector<2x24xf32>
      %34 = arith.addf %30, %33 : vector<2x24xf32>
      %c0_30 = arith.constant 0 : index
      %c2 = arith.constant 2 : index
      %c0_31 = arith.constant 0 : index
      %35 = vector.load %arg7[%c0_30, %c2, %c0_31] : memref<2x8x24xf32, #tpu.memory_space<vmem>>, vector<2x1x24xf32>
      %36 = vector.shape_cast %35 : vector<2x1x24xf32> to vector<2x24xf32>
      %37 = vector.shape_cast %34 : vector<2x24xf32> to vector<2x1x24xf32>
      tpu.vector_store %arg7[%c0_30, %c2, %c0_31], %37 {strides = array<i32>} : memref<2x8x24xf32, #tpu.memory_space<vmem>>, vector<2x1x24xf32>,
      %c0_32 = arith.constant 0 : index
      %c72 = arith.constant 72 : index
      %38 = vector.load %arg6[%c0_32, %c72] : memref<2x192xf32, #tpu.memory_space<vmem>>, vector<2x24xf32>
      %c0_33 = arith.constant 0 : index
      %c0_34 = arith.constant 0 : index
      %c72_35 = arith.constant 72 : index
      %39 = vector.load %arg4[%c0_33, %c0_34, %c72_35] : memref<1x1x192xf32, #tpu.memory_space<vmem>>, vector<1x1x24xf32>
      %40 = vector.shape_cast %39 : vector<1x1x24xf32> to vector<1x24xf32>
      %41 = vector.broadcast %40 : vector<1x24xf32> to vector<2x24xf32>
      %42 = arith.addf %38, %41 : vector<2x24xf32>
      %c0_36 = arith.constant 0 : index
      %c3 = arith.constant 3 : index
      %c0_37 = arith.constant 0 : index
      %43 = vector.load %arg7[%c0_36, %c3, %c0_37] : memref<2x8x24xf32, #tpu.memory_space<vmem>>, vector<2x1x24xf32>
      %44 = vector.shape_cast %43 : vector<2x1x24xf32> to vector<2x24xf32>
      %45 = vector.shape_cast %42 : vector<2x24xf32> to vector<2x1x24xf32>
      tpu.vector_store %arg7[%c0_36, %c3, %c0_37], %45 {strides = array<i32>} : memref<2x8x24xf32, #tpu.memory_space<vmem>>, vector<2x1x24xf32>,
      %c0_38 = arith.constant 0 : index
      %c96 = arith.constant 96 : index
      %46 = vector.load %arg6[%c0_38, %c96] : memref<2x192xf32, #tpu.memory_space<vmem>>, vector<2x24xf32>
      %c0_39 = arith.constant 0 : index
      %c0_40 = arith.constant 0 : index
      %c96_41 = arith.constant 96 : index
      %47 = vector.load %arg4[%c0_39, %c0_40, %c96_41] : memref<1x1x192xf32, #tpu.memory_space<vmem>>, vector<1x1x24xf32>
      %48 = vector.shape_cast %47 : vector<1x1x24xf32> to vector<1x24xf32>
      %49 = vector.broadcast %48 : vector<1x24xf32> to vector<2x24xf32>
      %50 = arith.addf %46, %49 : vector<2x24xf32>
      %c0_42 = arith.constant 0 : index
      %c4 = arith.constant 4 : index
      %c0_43 = arith.constant 0 : index
      %51 = vector.load %arg7[%c0_42, %c4, %c0_43] : memref<2x8x24xf32, #tpu.memory_space<vmem>>, vector<2x1x24xf32>
      %52 = vector.shape_cast %51 : vector<2x1x24xf32> to vector<2x24xf32>
      %53 = vector.shape_cast %50 : vector<2x24xf32> to vector<2x1x24xf32>
      tpu.vector_store %arg7[%c0_42, %c4, %c0_43], %53 {strides = array<i32>} : memref<2x8x24xf32, #tpu.memory_space<vmem>>, vector<2x1x24xf32>,
      %c0_44 = arith.constant 0 : index
      %c120 = arith.constant 120 : index
      %54 = vector.load %arg6[%c0_44, %c120] : memref<2x192xf32, #tpu.memory_space<vmem>>, vector<2x24xf32>
      %c0_45 = arith.constant 0 : index
      %c0_46 = arith.constant 0 : index
      %c120_47 = arith.constant 120 : index
      %55 = vector.load %arg4[%c0_45, %c0_46, %c120_47] : memref<1x1x192xf32, #tpu.memory_space<vmem>>, vector<1x1x24xf32>
      %56 = vector.shape_cast %55 : vector<1x1x24xf32> to vector<1x24xf32>
      %57 = vector.broadcast %56 : vector<1x24xf32> to vector<2x24xf32>
      %58 = arith.addf %54, %57 : vector<2x24xf32>
      %c0_48 = arith.constant 0 : index
      %c5 = arith.constant 5 : index
      %c0_49 = arith.constant 0 : index
      %59 = vector.load %arg7[%c0_48, %c5, %c0_49] : memref<2x8x24xf32, #tpu.memory_space<vmem>>, vector<2x1x24xf32>
      %60 = vector.shape_cast %59 : vector<2x1x24xf32> to vector<2x24xf32>
      %61 = vector.shape_cast %58 : vector<2x24xf32> to vector<2x1x24xf32>
      tpu.vector_store %arg7[%c0_48, %c5, %c0_49], %61 {strides = array<i32>} : memref<2x8x24xf32, #tpu.memory_space<vmem>>, vector<2x1x24xf32>,
      %c0_50 = arith.constant 0 : index
      %c144 = arith.constant 144 : index
      %62 = vector.load %arg6[%c0_50, %c144] : memref<2x192xf32, #tpu.memory_space<vmem>>, vector<2x24xf32>
      %c0_51 = arith.constant 0 : index
      %c0_52 = arith.constant 0 : index
      %c144_53 = arith.constant 144 : index
      %63 = vector.load %arg4[%c0_51, %c0_52, %c144_53] : memref<1x1x192xf32, #tpu.memory_space<vmem>>, vector<1x1x24xf32>
      %64 = vector.shape_cast %63 : vector<1x1x24xf32> to vector<1x24xf32>
      %65 = vector.broadcast %64 : vector<1x24xf32> to vector<2x24xf32>
      %66 = arith.addf %62, %65 : vector<2x24xf32>
      %c0_54 = arith.constant 0 : index
      %c6 = arith.constant 6 : index
      %c0_55 = arith.constant 0 : index
      %67 = vector.load %arg7[%c0_54, %c6, %c0_55] : memref<2x8x24xf32, #tpu.memory_space<vmem>>, vector<2x1x24xf32>
      %68 = vector.shape_cast %67 : vector<2x1x24xf32> to vector<2x24xf32>
      %69 = vector.shape_cast %66 : vector<2x24xf32> to vector<2x1x24xf32>
      tpu.vector_store %arg7[%c0_54, %c6, %c0_55], %69 {strides = array<i32>} : memref<2x8x24xf32, #tpu.memory_space<vmem>>, vector<2x1x24xf32>,
      %c0_56 = arith.constant 0 : index
      %c168 = arith.constant 168 : index
      %70 = vector.load %arg6[%c0_56, %c168] : memref<2x192xf32, #tpu.memory_space<vmem>>, vector<2x24xf32>
      %c0_57 = arith.constant 0 : index
      %c0_58 = arith.constant 0 : index
      %c168_59 = arith.constant 168 : index
      %71 = vector.load %arg4[%c0_57, %c0_58, %c168_59] : memref<1x1x192xf32, #tpu.memory_space<vmem>>, vector<1x1x24xf32>
      %72 = vector.shape_cast %71 : vector<1x1x24xf32> to vector<1x24xf32>
      %73 = vector.broadcast %72 : vector<1x24xf32> to vector<2x24xf32>
      %74 = arith.addf %70, %73 : vector<2x24xf32>
      %c0_60 = arith.constant 0 : index
      %c7 = arith.constant 7 : index
      %c0_61 = arith.constant 0 : index
      %75 = vector.load %arg7[%c0_60, %c7, %c0_61] : memref<2x8x24xf32, #tpu.memory_space<vmem>>, vector<2x1x24xf32>
      %76 = vector.shape_cast %75 : vector<2x1x24xf32> to vector<2x24xf32>
      %77 = vector.shape_cast %74 : vector<2x24xf32> to vector<2x1x24xf32>
      tpu.vector_store %arg7[%c0_60, %c7, %c0_61], %77 {strides = array<i32>} : memref<2x8x24xf32, #tpu.memory_space<vmem>>, vector<2x1x24xf32>,
      %c0_62 = arith.constant 0 : index
      %c0_63 = arith.constant 0 : index
      %c0_64 = arith.constant 0 : index
      %78 = vector.load %arg7[%c0_62, %c0_63, %c0_64] : memref<2x8x24xf32, #tpu.memory_space<vmem>>, vector<2x8x8xf32>
      %c0_65 = arith.constant 0 : index
      %c0_66 = arith.constant 0 : index
      %c8 = arith.constant 8 : index
      %79 = vector.load %arg7[%c0_65, %c0_66, %c8] : memref<2x8x24xf32, #tpu.memory_space<vmem>>, vector<2x8x8xf32>
      %c0_67 = arith.constant 0 : index
      %c0_68 = arith.constant 0 : index
      %c16 = arith.constant 16 : index
      %80 = vector.load %arg7[%c0_67, %c0_68, %c16] : memref<2x8x24xf32, #tpu.memory_space<vmem>>, vector<2x8x8xf32>
      "tpu.trace_start"() <{level = 10 : i32, message = "bqd,bkd->bqk"}> : () -> ()
      %cst_69 = arith.constant dense<0.000000e+00> : vector<2x8x8xf32>
      %81 = tpu.matmul %78, %79, %cst_69 {dimension_numbers = #tpu.dot_dimension_numbers<[2], [2], [1], [1], [0, 0, 0, 1, 1, 1], [0], [0]>} : vector<2x8x8xf32>, vector<2x8x8xf32>, vector<2x8x8xf32> -> vector<2x8x8xf32>
      "tpu.trace_stop"() : () -> ()
      %cst_70 = arith.constant dense<0xFF800000> : vector<2x8xf32>
      %82 = vector.multi_reduction <maximumf>, %81, %cst_70 [1] : vector<2x8x8xf32> to vector<2x8xf32>
      %83 = vector.shape_cast %82 : vector<2x8xf32> to vector<2x1x8xf32>
      %84 = vector.broadcast %83 : vector<2x1x8xf32> to vector<2x8x8xf32>
      %85 = arith.subf %81, %84 : vector<2x8x8xf32>
      %86 = math.exp %85 : vector<2x8x8xf32>
      %cst_71 = arith.constant dense<0.000000e+00> : vector<2x8xf32>
      %87 = vector.multi_reduction <add>, %86, %cst_71 [1] : vector<2x8x8xf32> to vector<2x8xf32>
      %88 = vector.shape_cast %87 : vector<2x8xf32> to vector<2x1x8xf32>
      %89 = tpu.reciprocal %88 {approx = true} : vector<2x1x8xf32> -> vector<2x1x8xf32>
      %90 = arith.mulf %88, %89 : vector<2x1x8xf32>
      %cst_72 = arith.constant 2.000000e+00 : f32
      %91 = vector.broadcast %cst_72 : f32 to vector<2x1x8xf32>
      %92 = arith.subf %91, %90 : vector<2x1x8xf32>
      %93 = arith.mulf %89, %92 : vector<2x1x8xf32>
      %cst_73 = arith.constant 0.353553385 : f32
      %94 = vector.broadcast %cst_73 : f32 to vector<2x1x8xf32>
      %95 = arith.mulf %93, %94 : vector<2x1x8xf32>
      %96 = vector.broadcast %95 : vector<2x1x8xf32> to vector<2x8x8xf32>
      %97 = arith.mulf %86, %96 : vector<2x8x8xf32>
      "tpu.trace_start"() <{level = 10 : i32, message = "bqk,bkd->bqd"}> : () -> ()
      %cst_74 = arith.constant dense<0.000000e+00> : vector<2x8x8xf32>
      %98 = tpu.matmul %97, %80, %cst_74 {dimension_numbers = #tpu.dot_dimension_numbers<[2], [1], [1], [2], [0, 0, 0, 1, 1, 2], [0], [0]>} : vector<2x8x8xf32>, vector<2x8x8xf32>, vector<2x8x8xf32> -> vector<2x8x8xf32>
      "tpu.trace_stop"() : () -> ()
      %c0_75 = arith.constant 0 : index
      %c0_76 = arith.constant 0 : index
      %c0_77 = arith.constant 0 : index
      %c0_78 = arith.constant 0 : index
      %99 = vector.load %arg5[%c0_75, %c0_76, %c0_77, %c0_78] : memref<1x2x8x8xf32, #tpu.memory_space<vmem>>, vector<1x2x8x8xf32>
      %100 = vector.shape_cast %99 : vector<1x2x8x8xf32> to vector<2x8x8xf32>
      %101 = vector.shape_cast %98 : vector<2x8x8xf32> to vector<1x2x8x8xf32>
      tpu.vector_store %arg5[%c0_75, %c0_76, %c0_77, %c0_78], %101 {strides = array<i32>} : memref<1x2x8x8xf32, #tpu.memory_space<vmem>>, vector<1x2x8x8xf32>,
    } else {
    }
    return
  }
  func.func @transform_0(%arg0: i32, %arg1: i32) -> (i32, i32, i32) {
    %c0_i32 = arith.constant 0 : i32
    %c0_i32_0 = arith.constant 0 : i32
    return %arg0, %c0_i32, %arg1 : i32, i32, i32
  }
  func.func @transform_1(%arg0: i32, %arg1: i32) -> (i32, i32, i32) {
    %c0_i32 = arith.constant 0 : i32
    %c0_i32_0 = arith.constant 0 : i32
    return %arg0, %arg1, %c0_i32 : i32, i32, i32
  }
  func.func @transform_2(%arg0: i32, %arg1: i32) -> (i32, i32, i32) {
    %c0_i32 = arith.constant 0 : i32
    %c0_i32_0 = arith.constant 0 : i32
    %c0_i32_1 = arith.constant 0 : i32
    return %arg0, %c0_i32, %c0_i32_0 : i32, i32, i32
  }
  func.func @transform_3(%arg0: i32, %arg1: i32) -> (i32, i32, i32, i32) {
    %c0_i32 = arith.constant 0 : i32
    %c0_i32_0 = arith.constant 0 : i32
    %c0_i32_1 = arith.constant 0 : i32
    %c0_i32_2 = arith.constant 0 : i32
    return %arg0, %c0_i32, %c0_i32_0, %c0_i32_1 : i32, i32, i32, i32
  }
}

</mosaic_0001>

<bundles_post_ra>
// kernel: tpu_custom_call.1
= control target key start
LH: loop header
LB: loop body
LE: loop exit
PB: predicated region body
PF: predicated region fallthrough
CT: control target
= control target key end

     0   :  { %s1562_s0 = inlined_call_operand.hbm [shape: f32[2,2,64], index: 0, kind: input, shape index: {}]   ;;  %s1563_s1 = inlined_call_operand.hbm [shape: f32[2,64,192], index: 1, kind: input, shape index: {}]   ;;  %s1564_s2 = inlined_call_operand.hbm [shape: f32[2,1,192], index: 2, kind: input, shape index: {}]   ;;  %s1565_s3 = inlined_call_operand.hbm [shape: f32[2,2,8,8], index: 3, kind: output, shape index: {}]  }
   0x1   :  { %1568 = sst [smem:[#allocation17_spill]] %s1563_s1 }
   0x2   :  { %8 = vsyncpa [#allocation5], 0 }
   0x3   :  { %10 = vsyncpa [#allocation5 + $0x1], 0 }
   0x4   :  { %11 = vsyncpa [#allocation8], 0 }
   0x5   :  { %13 = vsyncpa [#allocation8 + $0x1], 0 }
   0x6   :  { %14 = vsyncpa [#allocation6], 0 }
   0x7   :  { %16 = vsyncpa [#allocation6 + $0x1], 0  ;;  %s1243_s12 = smov 0   ;;  %s1245_s13 = smov 0  }
   0x8   :  { %s1247_s14 = smov 0   ;;  %s1249_s15 = smov 0  }
   0x9   :  { %s1251_s16 = smov 0   ;;  %s1253_s17 = smov 0  }
   0xa LB: > { %1569 = sst [smem:[#allocation14_spill]] %s1197_s14  ;;  %s1274_s18 = sadd.s32 4294967295, %s1209_s17   ;;  %s1209_s17 = sphi %s1253_s17, %s22_s17   ;;  %s1205_s16 = sphi %s1251_s16, %s1585_s16   ;;  %s1201_s15 = sphi %s1249_s15, %s1584_s15   ;;  %s1197_s14 = sphi %s1247_s14, %s1580_s14   ;;  %s1193_s13 = sphi %s1245_s13, %s1583_s13   ;;  %s1189_s12 = sphi %s1243_s12, %s1582_s12  }
   0xb   : > { %s899_s19 = sadd.s32 4294967294, %s1209_s17   ;;  %s34_s20 = sadd.s32 1, %s1205_s16 }
   0xc   : > { %s43_s21 = sadd.s32 1, %s1197_s14  ;;  %p36_p0 = scmp.ge.s32.totalorder %s34_s20, 2 }
   0xd   : > { %p50_p1 = scmp.ne.s32.totalorder %s1197_s14, %s1193_s13  ;;  %p51_p2 = scmp.eq.s32.totalorder %s1209_s17, 0 }
   0xe   : > { %p56_p3 = scmp.ne.s32.totalorder %s1193_s13, %s1189_s12  ;;  %s1587_s20 = smov (%p36_p0, %s34_s20), 0 }
   0xf   : > { %1570 = sst [smem:[#allocation15_spill]] %s1587_s20  ;;  %p1286_p4 = por %p51_p2, %p50_p1 }
  0x10   : > { %p57_p5 = scmp.eq.s32.totalorder %s1274_s18, 0  ;;  %s38_s23 = ssub.s32 %s1205_s16, %s1587_s20 }
  0x11   : > { %p134_p6 = scmp.eq.s32.totalorder %s1274_s18, 1  ;;  %p41_p7 = scmp.eq.s32.totalorder %s38_s23, 0 }
  0x12   : > { %p1294_p8 = por %p57_p5, %p56_p3  ;;  %p140_p10 = scmp.eq.s32.totalorder %s899_s19, 1 }
  0x13   : > { %p1298_p9 = por %p134_p6, %p50_p1  ;;  %p901_p12 = scmp.ge.s32.totalorder %s1209_s17, 2 }
  0x14   : > { %s1303_s26 = scalar_select %p41_p7, %s1197_s14, %s43_s21  }
  0x15   : > { %p1305_p11 = por %p140_p10, %p56_p3  ;;  %p951_p13 = scmp.lt.s32.totalorder %s1209_s17, 2 }
  0x16   : > { %1574 = sst [smem:[#allocation16_spill]] %s1303_s26  ;;  %s1312_s28 = sand.u32 1, %s1197_s14  }
  0x17   : > { %s180_s29 = sand.u32 1, %s1209_s17   ;;  %s904_s30 = sshll.u32 %s1312_s28, 7 }
  0x18   : > { %p1318_p0 = pnand %p951_p13, %p1286_p4  ;;  %s927_s5 = sshll.u32 %s1205_s16, 7 }
  0x19   : > { %s1577_s1 = sld [smem:[#allocation17_spill]]  ;;  %s184_s10 = scalar_lea.vmem [#allocation7], %s904_s30 }
  0x1a   : > { %s195_s11 = sshll.u32 %s184_s10, 4  ;;  %s181_s19 = scalar_lea.sflag [#allocation8], %s180_s29  ;;  %s196_s11 = int_to_ptr.vmem [resolvable:$true] %s195_s11 }
  0x1b   : > { %s1211_s21 = smov 256   ;;  %s1212_s22 = smov 16  }
  0x1c   : > { %p909_p1 = scmp.ge.s32.totalorder %s1209_s17, 1  ;;  %p222_p2 = scmp.lt.s32.totalorder %s1209_s17, 3 }
  0x1d   : > { %s902_s6 = sshll.u32 %s1312_s28, 1  ;;  %s161_s20 = scalar_lea.sflag [#allocation5], %s1312_s28 }
  0x1e   : > { %p1330_p3 = pnand %p909_p1, %p222_p2  ;;  %s164_s29 = scalar_lea.vmem [#allocation4], %s902_s6 }
  0x1f   : > { %s192_s8 = scalar_lea.hbm %s1577_s1, %s927_s5  ;;  %s903_s5 = sshll.u32 %s1205_s16, 1 }
  0x20   : > { %s193_s9 = sshll.u32 %s192_s8, 4  ;;  %s169_s8 = scalar_lea.hbm %s1562_s0, %s903_s5  ;;  %s194_s9 = int_to_ptr.hbm [resolvable:$true] %s193_s9 }
  0x21   : > { %943 = dma.hbm_to_vmem [thread:$0]  (!%p1318_p0), %s194_s9, 2048, %s196_s11, %s181_s19, %s1211_s21, %s1211_s21, %s1212_s22  }
  0x22   : > { %s171_s10 = sshll.u32 %s169_s8, 4  ;;  %s173_s1 = sshll.u32 %s164_s29, 4  ;;  %s172_s10 = int_to_ptr.hbm [resolvable:$true] %s171_s10  ;;  %s174_s1 = int_to_ptr.vmem [resolvable:$true] %s173_s1 }
  0x23   : > { %940 = dma.hbm_to_vmem [thread:$0]  (!%p1318_p0), %s172_s10, 32, %s174_s1, %s161_s20  }
  0x24   : > { %s213_s21 = scalar_lea.hbm %s1564_s2, %s903_s5  ;;  %s209_s26 = scalar_lea.vmem [#allocation9], %s902_s6 }
  0x25   : > { %s215_s22 = sshll.u32 %s213_s21, 4  ;;  %s217_s14 = sshll.u32 %s209_s26, 4  ;;  %s216_s22 = int_to_ptr.hbm [resolvable:$true] %s215_s22  ;;  %s218_s14 = int_to_ptr.vmem [resolvable:$true] %s217_s14 }
  0x26   : > { %946 = dma.hbm_to_vmem [thread:$0]  (!%p1318_p0), %s216_s22, 32, %s218_s14, %s181_s19  }
  0x27   : > { %226 = sbr.rel (%p1330_p3) target bundleno = 798 (0x31e), region = 32  ;;  %s1350_s30 = sand.u32 (!%p1330_p3), 1, %s1193_s13  }
  0x28   : > { %s910_s1 = sshll.u32 (!%p1330_p3), %s1350_s30, 1  ;;  %s229_s20 = scalar_lea.sflag (!%p1330_p3), [#allocation5], %s1350_s30 }
  0x29   : > { %s1356_s28 = scalar_lea.vmem (!%p1330_p3), [#allocation4], %s910_s1 }
  0x2c   : > { %1176 = dma.done.wait (%p1294_p8), %s229_s20, 32  }
  0x2d   : > { %1178 = vsyncadd (%p1294_p8), %s229_s20, 4294967264  ;;  %s238_s14 = sand.u32 1, %s1274_s18   ;;  %s911_s26 = sshll.u32 %s1350_s30, 7 }
  0x2e   : > { %s239_s4 = scalar_lea.sflag [#allocation8], %s238_s14  ;;  %s242_s19 = scalar_lea.vmem [#allocation7], %s911_s26 }
  0x2f   : > { %1180 = dma.done.wait (%p1294_p8), %s239_s4, 2080  }
  0x30   : > { %1182 = vsyncadd (%p1294_p8), %s239_s4, 4294965216  ;;  %v312_v0 = vld [vmem:[%s242_s19 + $0x78] sm:$0xff]  ;;  %v311_v1 = vld [vmem:[%s242_s19 + $0x70] sm:$0xff]  ;;  %vm313_vm0 = vcmask 523264   ;;  %s1371_s18 = scalar_lea.vmem [#allocation9], %s910_s1  ;;  %vm291_vm1 = vcmask 1041408  }
  0x31   : > { %v310_v2 = vld [vmem:[%s242_s19 + $0x68] sm:$0xff]  ;;  %345 = vmatpush.msra.mxu1 %v312_v0  ;;  %325 = vmatpush.msra.mxu0 %v311_v1  ;;  %v309_v3 = vld [vmem:[%s242_s19 + $0x60] sm:$0xff]  ;;  %v308_v4 = vld [vmem:[%s242_s19 + $0x58] sm:$0xff]  ;;  %vm292_vm2 = vcmask 519170   ;;  %v1213_v17 = vmov 0.0   ;;  %vm380_vm4 = vcmask 1040384  }
  0x32   : > { %v307_v5 = vld [vmem:[%s242_s19 + $0x50] sm:$0xff]  ;;  %v306_v6 = vld [vmem:[%s242_s19 + $0x48] sm:$0xff]  ;;  %v305_v7 = vld [vmem:[%s242_s19 + $0x40] sm:$0xff]  ;;  %vm382_vm5 = vcmask 1042434   ;;  %vm385_vm6 = vcmask 1041409   ;;  %vm387_vm7 = vcmask 1043459  }
  0x33   : > { %346 = vmatpush.msra.mxu1 %v310_v2  ;;  %326 = vmatpush.msra.mxu0 %v309_v3  ;;  %v304_v8 = vld [vmem:[%s242_s19 + $0x38] sm:$0xff]  ;;  %v303_v9 = vld [vmem:[%s242_s19 + $0x30] sm:$0xff]  ;;  %v302_v10 = vld [vmem:[%s242_s19 + $0x28] sm:$0xff]  ;;  %vm389_vm8 = vcmask 1042433   ;;  %s1214_s24 = smov 8   ;;  %s1215_s23 = smov 32  }
  0x34   : > { %v301_v11 = vld [vmem:[%s242_s19 + $0x20] sm:$0xff]  ;;  %v300_v12 = vld [vmem:[%s242_s19 + $0x18] sm:$0xff]  ;;  %v299_v13 = vld [vmem:[%s242_s19 + $0x10] sm:$0xff]  ;;  %s1216_s6 = smov 104   ;;  %s1217_s5 = smov 56   ;;  %vm394_vm9 = vcmask 188416  }
  0x35   : > { %347 = vmatpush.msra.mxu1 %v308_v4  ;;  %327 = vmatpush.msra.mxu0 %v307_v5  ;;  %v298_v14 = vld [vmem:[%s242_s19 + $0x8] sm:$0xff]  ;;  %v297_v15 = vld [vmem:[%s242_s19] sm:$0xff]  ;;  %v296_v16 = vld [vmem:[%s1356_s28] sm:$0x3]  ;;  %s1218_s7 = smov 80   ;;  %s1219_s8 = smov 112  }
  0x36   : > { %vm293_vm3 = vmor %vm292_vm2, %vm291_vm1  ;;  %v506_v20 = vld [vmem:[%s1371_s18] sm:$0x3]  ;;  %s1220_s10 = smov 88   ;;  %vm537_vm10 = vcmask 64512   ;;  %s1221_s29 = smov 120  }
  0x37   : > { %348 = vmatpush.msra.mxu1 %v306_v6  ;;  %328 = vmatpush.msra.mxu0 %v305_v7  ;;  %294 = vst.msk [vmem:[#allocation2] sm:$0xf] %vm293_vm3, %v1213_v17  ;;  %v509_v24 = vperm.slane %v506_v20, 1  ;;  %v508_v26 = vperm.slane %v506_v20, 0  ;;  %v1019_v28 = vld [vmem:[%s1371_s18] ss:$0 sm:$0xff] }
  0x38   : > { %v1020_v30 = vld [vmem:[%s1371_s18] ss:$0 sm:$0xff]  ;;  %s913_s9 = sshll.u32 %s1350_s30, 4  ;;  %s928_s11 = sshll.u32 %s1201_s15, 4 }
  0x39   : > { %349 = vmatpush.msra.mxu1 %v304_v8  ;;  %329 = vmatpush.msra.mxu0 %v303_v9  ;;  %v510_v27 = vrot.slane %v509_v24, 6  ;;  %v1018_v36 = vld [vmem:[%s1371_s18] ss:$0 sm:$0xff]  ;;  %s285_s21 = scalar_lea.vmem [#allocation10], %s913_s9  ;;  %s766_s20 = scalar_lea.hbm %s1565_s3, %s928_s11 }
  0x3a   : > { %v1021_v38 = vld [vmem:[%s1371_s18] ss:$0 sm:$0xff]  ;;  %s767_s28 = sshll.u32 %s285_s21, 4  ;;  %s769_s14 = sshll.u32 %s766_s20, 4  ;;  %s768_s28 = int_to_ptr.vmem [resolvable:$true] %s767_s28  ;;  %s770_s14 = int_to_ptr.hbm [resolvable:$true] %s769_s14 }
  0x3b   : > { %350 = vmatpush.msra.mxu1 %v302_v10  ;;  %330 = vmatpush.msra.mxu0 %v301_v11  ;;  %v511_v29 = vsel %vm291_vm1, %v508_v26, %v510_v27  ;;  %v1022_v49 = vld [vmem:[%s1371_s18] ss:$0 sm:$0xff]  ;;  %s755_s26 = scalar_lea.sflag [#allocation6], %s1350_s30  ;;  %s1137_s4 = sshra.s32 %s770_s14, 4  ;;  %s1138_s4 = int_to_ptr.hbm [resolvable:$true] %s1137_s4 }
  0x3c   : > { %s1139_s15 = scalar_lea.hbm %s1138_s4, 16  ;;  %p1144_p7 = scmp.lt.s32.totalorder %s1138_s4, %s1565_s3 }
  0x3d   : > { %351 = vmatpush.msra.mxu1 %v300_v12  ;;  %331 = vmatpush.msra.mxu0 %v299_v13  ;;  %p1140_p4 = scmp.ne.s32.totalorder %s1138_s4, %s1139_s15 }
  0x3e   : > { %v295_v22 = vld [vmem:[#allocation2] sm:$0xf] }
  0x3f   : > { %352 = vmatpush.msra.mxu1 %v298_v14  ;;  %332 = vmatpush.msra.mxu0 %v297_v15  ;;  %p1141_p5 = pnand %p1140_p4, %p1298_p9 }
  0x40   : > { %915 = vmatmul.msk.f32.vlgmr.msra.gmra.mxu1 %vm313_vm0, %v296_v16  ;;  %914 = vmatmul.msk.f32.vlgmr.msra.gmra.mxu0 %vm313_vm0, %v296_v16  ;;  %v1023_v16 = vld [vmem:[%s1371_s18 + $0x1] ss:$0 sm:$0xff] }
  0x41   : > { %p1142_p6 = pneg %p1141_p5 }
  0xbd   : > { %v354_v18 = vpop.f32.mrf.mxu1  ;;  %v334_v19 = vpop.f32.mrf.mxu0 }
  0xbe   : > { %v359_v21 = vrot.slane %v354_v18, 6 }
  0xc0   : > { %v361_v23 = vsel %vm291_vm1, %v334_v19, %v359_v21 }
  0xc1   : > { %v363_v25 = vadd.f32 %v361_v23, %v295_v22 }
  0xc3   : > { %366 = vst.msk [vmem:[#allocation2] sm:$0xf] %vm293_vm3, %v363_v25 }
  0xca   : > { %v505_v31 = vld [vmem:[#allocation2] sm:$0xf] }
  0xcb   : > { %v478_v32 = vld [vmem:[#allocation2] sm:$0x3]  ;;  %v513_v33 = vadd.f32 %v511_v29, %v505_v31  ;;  %v544_v19 = vld [vmem:[#allocation2 + $0x2] sm:$0x3] }
  0xcc   : > { %v1379_v34 = vadd.f32 %v1019_v28, %v478_v32  ;;  %v397_v35 = vld [vmem:[#allocation2] sm:$0x3]  ;;  %v549_v27 = vadd.f32 %v1023_v16, %v544_v19 }
  0xcd   : > { %v1382_v37 = vadd.f32 %v1020_v30, %v397_v35  ;;  %v515_v39 = vrot.slane %v513_v33, 1  ;;  %v516_v40 = vrot.slane %v513_v33, 2  ;;  %v517_v41 = vrot.slane %v513_v33, 3  ;;  %v451_v42 = vld [vmem:[#allocation2] sm:$0x3] }
  0xce   : > { %v370_v43 = vld [vmem:[#allocation2] sm:$0x3]  ;;  %v485_v44 = vrot.slane %v1379_v34, 1  ;;  %v486_v45 = vrot.slane %v1379_v34, 2  ;;  %v487_v48 = vrot.slane %v1379_v34, 3  ;;  %v1397_v53 = vadd.f32 %v1021_v38, %v451_v42 }
  0xcf   : > { %v518_v46 = vsel %vm380_vm4, %v513_v33, %v515_v39  ;;  %v519_v47 = vsel %vm382_vm5, %v516_v40, %v517_v41  ;;  %v404_v52 = vrot.slane %v1382_v37, 1  ;;  %v424_v54 = vld [vmem:[#allocation2] sm:$0x3]  ;;  %v375_v56 = vadd.f32 %v1018_v36, %v370_v43 }
  0xd0   : > { %v520_v50 = vsel %vm291_vm1, %v518_v46, %v519_v47  ;;  %v488_v51 = vsel %vm380_vm4, %v1379_v34, %v485_v44  ;;  %v489_v57 = vsel %vm382_vm5, %v486_v45, %v487_v48  ;;  %v405_v58 = vrot.slane %v1382_v37, 2 }
  0xd1   : > { %v525_v55 = vperm.slane %v520_v50, 0  ;;  %v490_v59 = vsel %vm291_vm1, %v488_v51, %v489_v57  ;;  %v406_v60 = vrot.slane %v1382_v37, 3  ;;  %v407_v61 = vsel %vm380_vm4, %v1382_v37, %v404_v52  ;;  %v571_v57 = vld [vmem:[#allocation2 + $0x2] sm:$0x3] }
  0xd2   : > { %v521_v62 = vsel %vm385_vm6, %v513_v33, %v515_v39  ;;  %v495_v63 = vperm.slane %v490_v59, 0  ;;  %v522_v0 = vsel %vm387_vm7, %v516_v40, %v517_v41  ;;  %v429_v1 = vadd.f32 %v1022_v49, %v424_v54  ;;  %v1024_v54 = vld [vmem:[%s1371_s18 + $0x1] ss:$0 sm:$0xff] }
  0xd3   : > { %529 = vrot.lane.b32.xlu0 %v525_v55, %s1214_s24  ;;  %v408_v2 = vsel %vm382_vm5, %v405_v58, %v406_v60  ;;  %v523_v3 = vsel %vm389_vm8, %v521_v62, %v522_v0  ;;  %v458_v4 = vrot.slane %v1397_v53, 1  ;;  %v377_v5 = vrot.slane %v375_v56, 1 }
  0xd4   : > { %497 = vrot.lane.b32.xlu1 %v495_v63, %s1215_s23  ;;  %v409_v6 = vsel %vm291_vm1, %v407_v61, %v408_v2  ;;  %v459_v7 = vrot.slane %v1397_v53, 2  ;;  %v460_v8 = vrot.slane %v1397_v53, 3  ;;  %v378_v9 = vrot.slane %v375_v56, 2 }
  0xd5   : > { %v379_v10 = vrot.slane %v375_v56, 3  ;;  %v414_v11 = vperm.slane %v409_v6, 0  ;;  %v524_v12 = vrot.slane %v523_v3, 1  ;;  %v431_v13 = vrot.slane %v429_v1, 1 }
  0xd6   : > { %v432_v14 = vrot.slane %v429_v1, 2  ;;  %v433_v15 = vrot.slane %v429_v1, 3  ;;  %v461_v17 = vsel %vm380_vm4, %v1397_v53, %v458_v4  ;;  %v462_v18 = vsel %vm382_vm5, %v459_v7, %v460_v8 }
  0xd7   : > { %416 = vrot.lane.b32.xlu2 %v414_v11, %s1216_s6  ;;  %v526_v20 = vperm.slane %v520_v50, 1  ;;  %v527_v21 = vperm.slane %v524_v12, 0  ;;  %v386_v22 = vsel %vm385_vm6, %v375_v56, %v377_v5  ;;  %v388_v23 = vsel %vm387_vm7, %v378_v9, %v379_v10 }
  0xd8   : > { %v463_v24 = vsel %vm291_vm1, %v461_v17, %v462_v18  ;;  %v434_v25 = vsel %vm380_vm4, %v429_v1, %v431_v13  ;;  %v435_v26 = vsel %vm382_vm5, %v432_v14, %v433_v15  ;;  %v410_v28 = vsel %vm385_vm6, %v1382_v37, %v404_v52 }
  0xd9   : > { %v411_v29 = vsel %vm387_vm7, %v405_v58, %v406_v60  ;;  %v381_v30 = vsel %vm380_vm4, %v375_v56, %v377_v5  ;;  %v383_v31 = vsel %vm382_vm5, %v378_v9, %v379_v10  ;;  %v390_v32 = vsel %vm389_vm8, %v386_v22, %v388_v23 }
  0xda   : > { %v468_v33 = vperm.slane %v463_v24, 0  ;;  %v436_v35 = vsel %vm291_vm1, %v434_v25, %v435_v26  ;;  %v412_v36 = vsel %vm389_vm8, %v410_v28, %v411_v29  ;;  %v551_v38 = vrot.slane %v549_v27, 1 }
  0xdb   : > { %531 = vrot.lane.b32.xlu0 %v526_v20, %s1214_s24  ;;  %v552_v39 = vrot.slane %v549_v27, 2  ;;  %v553_v40 = vrot.slane %v549_v27, 3  ;;  %v437_v37 = vsel %vm385_vm6, %v429_v1, %v431_v13  ;;  %v438_v41 = vsel %vm387_vm7, %v432_v14, %v433_v15 }
  0xdc   : > { %533 = vrot.lane.b32.xlu1 %v527_v21, %s1214_s24  ;;  %v441_v42 = vperm.slane %v436_v35, 0  ;;  %v413_v43 = vrot.slane %v412_v36, 1  ;;  %v384_v46 = vsel %vm291_vm1, %v381_v30, %v383_v31  ;;  %v391_v47 = vrot.slane %v390_v32, 1 }
  0xdd   : > { %v528_v49 = vperm.slane %v524_v12, 1  ;;  %v439_v50 = vsel %vm389_vm8, %v437_v37, %v438_v41  ;;  %v554_v51 = vsel %vm380_vm4, %v549_v27, %v551_v38  ;;  %v555_v52 = vsel %vm382_vm5, %v552_v39, %v553_v40  ;;  %395 = vst.msk [vmem:[#allocation3] sm:$0x1] %vm394_vm9, %v384_v46 }
  0xde   : > { %v491_v55 = vsel %vm385_vm6, %v1379_v34, %v485_v44  ;;  %v492_v56 = vsel %vm387_vm7, %v486_v45, %v487_v48  ;;  %396 = vst.msk [vmem:[#allocation3 + $0x8] sm:$0x1] %vm394_vm9, %v391_v47  ;;  %v415_v58 = vperm.slane %v413_v43, 0  ;;  %v440_v59 = vrot.slane %v439_v50, 1 }
  0xdf   : > { %470 = vrot.lane.b32.xlu2 %v468_v33, %s1217_s5  ;;  %v556_v60 = vsel %vm291_vm1, %v554_v51, %v555_v52  ;;  %v493_v61 = vsel %vm389_vm8, %v491_v55, %v492_v56  ;;  %v464_v44 = vsel %vm385_vm6, %v1397_v53, %v458_v4  ;;  %v465_v34 = vsel %vm387_vm7, %v459_v7, %v460_v8 }
  0xe0   : > { %v576_v45 = vadd.f32 %v1024_v54, %v571_v57  ;;  %v561_v48 = vperm.slane %v556_v60, 0  ;;  %v557_v62 = vsel %vm385_vm6, %v549_v27, %v551_v38  ;;  %v558_v63 = vsel %vm387_vm7, %v552_v39, %v553_v40 }
  0xe1   : > { %v494_v0 = vrot.slane %v493_v61, 1  ;;  %v466_v1 = vsel %vm389_vm8, %v464_v44, %v465_v34  ;;  %v442_v2 = vperm.slane %v440_v59, 0  ;;  %v559_v5 = vsel %vm389_vm8, %v557_v62, %v558_v63 }
  0xe2   : > { %v578_v3 = vrot.slane %v576_v45, 1  ;;  %v579_v4 = vrot.slane %v576_v45, 2  ;;  %v580_v53 = vrot.slane %v576_v45, 3  ;;  %v467_v6 = vrot.slane %v466_v1, 1 }
  0xe3   : > { %443 = vrot.lane.b32.xlu0 %v441_v42, %s1218_s7  ;;  %v496_v7 = vperm.slane %v494_v0, 0  ;;  %v560_v8 = vrot.slane %v559_v5, 1 }
  0xe4   : > { %535 = vrot.lane.b32.xlu1 %v528_v49, %s1214_s24  ;;  %v584_v9 = vsel %vm385_vm6, %v576_v45, %v578_v3  ;;  %v585_v10 = vsel %vm387_vm7, %v579_v4, %v580_v53  ;;  %v581_v11 = vsel %vm380_vm4, %v576_v45, %v578_v3  ;;  %v582_v12 = vsel %vm382_vm5, %v579_v4, %v580_v53 }
  0xe5   : > { %v469_v13 = vperm.slane %v467_v6, 0  ;;  %v586_v14 = vsel %vm389_vm8, %v584_v9, %v585_v10  ;;  %v562_v15 = vperm.slane %v560_v8, 0  ;;  %v583_v16 = vsel %vm291_vm1, %v581_v11, %v582_v12 }
  0xe6   : > { %v587_v17 = vrot.slane %v586_v14, 1  ;;  %v588_v18 = vperm.slane %v583_v16, 0 }
  0xe7   : > { %418 = vrot.lane.b32.xlu2 %v415_v58, %s1216_s6 }
  0xe8   : > { %v589_v19 = vperm.slane %v587_v17, 0 }
  0xeb   : > { %563 = vrot.lane.b32.xlu0 %v561_v48, %s1219_s8 }
  0xec   : > { %445 = vrot.lane.b32.xlu1 %v442_v2, %s1218_s7 }
  0xef   : > { %499 = vrot.lane.b32.xlu2 %v496_v7, %s1215_s23  ;;  %s1143_s23 = scalar_lea.hbm %s1565_s3, 32 }
  0xf0   : > { %p1145_p8 = scmp.lt.s32.totalorder %s1143_s23, %s1139_s15 }
  0xf2   : > { %p1146_p10 = por %p1145_p8, %p1144_p7 }
  0xf3   : > { %472 = vrot.lane.b32.xlu0 %v469_v13, %s1217_s5 }
  0xf4   : > { %565 = vrot.lane.b32.xlu1 %v562_v15, %s1219_s8  ;;  %p1147_p13 = pnand %p1146_p10, %p1142_p6 }
  0xf7   : > { %590 = vrot.lane.b32.xlu2 %v588_v18, %s1220_s10 }
  0xfb   : > { %592 = vrot.lane.b32.xlu0 %v589_v19, %s1220_s10 }
 0x131   : > { %v417_v20 = vpop.permute.xlu2 %416 }
 0x132   : > { %422 = vst.msk [vmem:[#allocation3 + $0x1] sm:$0x1] %vm394_vm9, %v417_v20 }
 0x139   : > { %v471_v21 = vpop.permute.xlu2 %470 }
 0x13a   : > { %476 = vst.msk [vmem:[#allocation3 + $0x3] sm:$0x1] %vm394_vm9, %v471_v21 }
 0x141   : > { %v419_v22 = vpop.permute.xlu2 %418 }
 0x142   : > { %423 = vst.msk [vmem:[#allocation3 + $0x9] sm:$0x1] %vm394_vm9, %v419_v22 }
 0x145   : > { %v530_v23 = vpop.permute.xlu0 %529 }
 0x146   : > { %v498_v24 = vpop.permute.xlu1 %497 }
 0x147   : > { %503 = vst.msk [vmem:[#allocation3 + $0x4] sm:$0x1] %vm394_vm9, %v498_v24 }
 0x149   : > { %v500_v25 = vpop.permute.xlu2 %499 }
 0x14a   : > { %504 = vst.msk [vmem:[#allocation3 + $0xc] sm:$0x1] %vm394_vm9, %v500_v25 }
 0x14d   : > { %v532_v26 = vpop.permute.xlu0 %531 }
 0x14e   : > { %v538_v27 = vsel %vm537_vm10, %v530_v23, %v532_v26  ;;  %v534_v28 = vpop.permute.xlu1 %533 }
 0x14f   : > { %542 = vst.msk [vmem:[#allocation3 + $0x5] sm:$0x1] %vm394_vm9, %v538_v27 }
 0x151   : > { %v591_v29 = vpop.permute.xlu2 %590 }
 0x152   : > { %596 = vst.msk [vmem:[#allocation3 + $0x7] sm:$0x1] %vm394_vm9, %v591_v29 }
 0x155   : > { %v444_v30 = vpop.permute.xlu0 %443 }
 0x156   : > { %449 = vst.msk [vmem:[#allocation3 + $0x2] sm:$0x1] %vm394_vm9, %v444_v30  ;;  %v536_v31 = vpop.permute.xlu1 %535 }
 0x157   : > { %v539_v32 = vsel %vm537_vm10, %v534_v28, %v536_v31 }
 0x158   : > { %543 = vst.msk [vmem:[#allocation3 + $0xd] sm:$0x1] %vm394_vm9, %v539_v32 }
 0x15d   : > { %v564_v33 = vpop.permute.xlu0 %563 }
 0x15e   : > { %569 = vst.msk [vmem:[#allocation3 + $0x6] sm:$0x1] %vm394_vm9, %v564_v33  ;;  %v446_v35 = vpop.permute.xlu1 %445 }
 0x15f   : > { %450 = vst.msk [vmem:[#allocation3 + $0xa] sm:$0x1] %vm394_vm9, %v446_v35 }
 0x165   : > { %v473_v36 = vpop.permute.xlu0 %472  ;;  %v598_v38 = vld [vmem:[#allocation3] sm:$0xff] }
 0x166   : > { %477 = vst.msk [vmem:[#allocation3 + $0xb] sm:$0x1] %vm394_vm9, %v473_v36  ;;  %601 = vrot.lane.b32.xlu1 %v598_v38, %s1221_s29  ;;  %v566_v39 = vpop.permute.xlu1 %565 }
 0x167   : > { %570 = vst.msk [vmem:[#allocation3 + $0xe] sm:$0x1] %vm394_vm9, %v566_v39 }
 0x16d   : > { %v593_v40 = vpop.permute.xlu0 %592 }
 0x16e   : > { %597 = vst.msk [vmem:[#allocation3 + $0xf] sm:$0x1] %vm394_vm9, %v593_v40 }
 0x175   : > { %v599_v37 = vld [vmem:[#allocation3 + $0x8] sm:$0xff] }
 0x176   : > { %628 = vrot.lane.b32.xlu2 %v599_v37, %s1221_s29  ;;  %v1013_v41 = vpack.i.bf16 %v599_v37, %v598_v38 }
 0x178   : > { %1014 = vrot.lane.b32.xlu0 %v1013_v41, %s1219_s8 }
 0x1d0   : > { %v629_v42 = vpop.permute.xlu2 %628 }
 0x1d1   : > { %918 = vmatpush.xpose.msk.msra.mxu3 %vm537_vm10, %v629_v42 }
 0x1d4   : > { %919 = vmatmul.msk.f32.vlgmr.msra.gmra.mxu3 %vm537_vm10, %v599_v37 }
 0x1d8   : > { %v602_v43 = vpop.permute.xlu1 %601 }
 0x1d9   : > { %916 = vmatpush.xpose.msk.msra.mxu2 %vm537_vm10, %v602_v43 }
 0x1dc   : > { %917 = vmatmul.msk.f32.vlgmr.msra.gmra.mxu2 %vm537_vm10, %v598_v38 }
 0x1ea   : > { %v1015_v46 = vpop.permute.xlu0 %1014 }
 0x1eb   : > { %v1017_v47 = vunpack.i.h.bf16 %v1015_v46  ;;  %v1016_v49 = vunpack.i.l.bf16 %v1015_v46 }
 0x1ed   : > { %721 = vmatpush.msrb.mxu2 %v1016_v49  ;;  %747 = vmatpush.msrb.mxu3 %v1017_v47 }
 0x257   : > { %v651_v50 = vpop.f32.mrf.mxu3 }
 0x258   : > { %v661_v51 = vsel %vm537_vm10, %v651_v50, -inf }
 0x259   : > { %v662_v52 = vrot.slane %v661_v51, 4 }
 0x25b   : > { %v663_v54 = vmax.f32 %v661_v51, %v662_v52 }
 0x25d   : > { %v664_v55 = vrot.slane %v663_v54, 2 }
 0x25f   : > { %v665_v56 = vmax.f32 %v663_v54, %v664_v55  ;;  %v624_v57 = vpop.f32.mrf.mxu2 }
 0x260   : > { %v654_v58 = vsel %vm537_vm10, %v624_v57, -inf }
 0x261   : > { %v666_v59 = vrot.slane %v665_v56, 1  ;;  %v655_v60 = vrot.slane %v654_v58, 4 }
 0x263   : > { %v667_v61 = vmax.f32 %v665_v56, %v666_v59  ;;  %v656_v44 = vmax.f32 %v654_v58, %v655_v60 }
 0x265   : > { %v669_v34 = vsub.f32 %v651_v50, %v667_v61  ;;  %v657_v45 = vrot.slane %v656_v44, 2 }
 0x267   : > { %v672_v48 = vmul.f32 1.442695, %v669_v34  ;;  %v658_v62 = vmax.f32 %v656_v44, %v657_v45 }
 0x269   : > { %1025 = vpow2.f32 %v672_v48  ;;  %v659_v63 = vrot.slane %v658_v62, 1 }
 0x26b   : > { %v660_v0 = vmax.f32 %v658_v62, %v659_v63 }
 0x26d   : > { %v668_v1 = vsub.f32 %v624_v57, %v660_v0 }
 0x26f   : > { %v1026_v2 = vpop.eup %1025  ;;  %v670_v3 = vmul.f32 1.442695, %v668_v1 }
 0x270   : > { %v681_v4 = vsel %vm537_vm10, %v1026_v2, 0.0 }
 0x271   : > { %v682_v53 = vrot.slane %v681_v4, 4  ;;  %1027 = vpow2.f32 %v670_v3 }
 0x273   : > { %v683_v5 = vadd.f32 %v682_v53, %v681_v4 }
 0x275   : > { %v684_v6 = vrot.slane %v683_v5, 2 }
 0x277   : > { %v1028_v7 = vpop.eup %1027  ;;  %v685_v8 = vadd.f32 %v684_v6, %v683_v5 }
 0x278   : > { %v674_v9 = vsel %vm537_vm10, %v1028_v7, 0.0 }
 0x279   : > { %v686_v10 = vrot.slane %v685_v8, 1  ;;  %v675_v11 = vrot.slane %v674_v9, 4 }
 0x27b   : > { %v676_v12 = vadd.f32 %v675_v11, %v674_v9  ;;  %v687_v13 = vadd.f32 %v686_v10, %v685_v8 }
 0x27d   : > { %v677_v14 = vrot.slane %v676_v12, 2  ;;  %1029 = vrcp.f32 %v687_v13 }
 0x27f   : > { %v678_v15 = vadd.f32 %v677_v14, %v676_v12 }
 0x281   : > { %v679_v16 = vrot.slane %v678_v15, 1 }
 0x283   : > { %v1030_v17 = vpop.eup %1029  ;;  %v680_v18 = vadd.f32 %v679_v16, %v678_v15 }
 0x284   : > { %v691_v19 = vmul.f32 %v1030_v17, %v687_v13 }
 0x285   : > { %1031 = vrcp.f32 %v680_v18 }
 0x286   : > { %v693_v20 = vsub.f32 2.0, %v691_v19 }
 0x288   : > { %v695_v21 = vmul.f32 %v1030_v17, %v693_v20 }
 0x28a   : > { %v697_v22 = vmul.f32 0.35355338, %v695_v21 }
 0x28b   : > { %v1032_v23 = vpop.eup %1031 }
 0x28c   : > { %v699_v24 = vmul.f32 %v1026_v2, %v697_v22  ;;  %v690_v25 = vmul.f32 %v1032_v23, %v680_v18 }
 0x28e   : > { %921 = vmatmul.msk.f32.vlgmr.msrb.gmra.mxu3 %vm537_vm10, %v699_v24  ;;  %v692_v26 = vsub.f32 2.0, %v690_v25 }
 0x290   : > { %v694_v27 = vmul.f32 %v1032_v23, %v692_v26 }
 0x292   : > { %v696_v28 = vmul.f32 0.35355338, %v694_v27 }
 0x294   : > { %v698_v29 = vmul.f32 %v1028_v7, %v696_v28 }
 0x296   : > { %920 = vmatmul.msk.f32.vlgmr.msrb.gmra.mxu2 %vm537_vm10, %v698_v29 }
 0x311   : > { %v749_v30 = vpop.f32.mrf.mxu3 }
 0x312   : > { %753 = vst.msk [vmem:[%s285_s21 + $0x8] sm:$0xff] %vm537_vm10, %v749_v30 }
 0x319   : > { %v723_v31 = vpop.f32.mrf.mxu2 }
 0x31a   : > { %752 = vst.msk [vmem:[%s285_s21] sm:$0xff] %vm537_vm10, %v723_v31 }
 0x31b   : > { %1150 = shalt.err (!%p1147_p13)
}
 0x31c   : > { %s1222_s30 = smov 128  }
 0x31d   : > { %935 = dma.vmem_to_hbm [thread:$0]  (%p1298_p9), %s768_s28, 256, %s770_s14, %s755_s26, %s1222_s30, %s1222_s30, %s1214_s24  }
 0x31e PF: > { %s784_s7 = sand.u32 1, %s1189_s12   ;;  %p948_p0 = pnand %p901_p12, %p1305_p11 }
 0x31f   : > { %s785_s8 = scalar_lea.sflag [#allocation6], %s784_s7 }
 0x320   : > { %p949_p1 = pneg %p948_p0 }
 0x322   : > { %1184 = dma.done.wait (%p949_p1), %s785_s8, 256  }
 0x323   : > { %1186 = vsyncadd (%p949_p1), %s785_s8, 4294967040  ;;  %s22_s17 = sadd.s32 1, %s1209_s17   ;;  %s1579_s10 = sld [smem:[#allocation14_spill]] }
 0x324   : > { %p19_p2 = scmp.ge.s32.totalorder %s22_s17, 4   ;;  %s1580_s14 = sld [smem:[#allocation16_spill]] }
 0x325   : > { %s1581_s25 = sld [smem:[#allocation15_spill]]  ;;  %s1582_s12 = smov %s1193_s13 }
 0x326   : > { %s1584_s15 = smov %s1205_s16 }
 0x327   :  { %21 = sbr.rel (!%p19_p2) target bundleno = 10 (0xa), region = 109 }
 0x329   : > { %s1583_s13 = smov %s1579_s10 }
 0x32b   : > { %s1585_s16 = smov %s1581_s25 }
 0x32c   :  { %791 = vsyncpa [#allocation5], 1 }
 0x32d   :  { %793 = vsyncpa [#allocation5 + $0x1], 1 }
 0x32e   :  { %794 = vsyncpa [#allocation8], 1 }
 0x32f   :  { %796 = vsyncpa [#allocation8 + $0x1], 1 }
 0x330   :  { %797 = vsyncpa [#allocation6], 1 }
 0x331   :  { %799 = vsyncpa [#allocation6 + $0x1], 1 }

</bundles_post_ra>
